<compile_context>
chip_gen: v5e
topology: v5e:2x2
jax: 0.10.0
libtpu: 0.0.40
codegen_flags: <defaults>
</compile_context>

<pallas_src>
import math

import jax
import jax.numpy as jnp
from jax.experimental import pallas as pl
from jax.experimental.pallas import tpu as pltpu


def _round_up(n, m):
    return ((n + m - 1) // m) * m


def _cdiv(a, b):
    return -(-a // b)


def _choose_tm(batch, tile_m):
    """Pick the lane-axis batch tile: multiple of 128, even grid step count."""
    tile_m = max(128, (int(tile_m) // 128) * 128)
    if batch <= tile_m:
        return batch  # single grid step; lane dim == full array dim is legal
    steps = _cdiv(batch, tile_m)
    if steps % 2:  # make step count even so v7x's 2 TCs split the grid evenly
        steps += 1
    tm = _round_up(_cdiv(batch, steps), 128)
    return min(tm, tile_m)


def _mlp_kernel(xT_ref, w1_ref, b1_ref, w2_ref, b2_ref, w3_ref, b3_ref, oT_ref):
    """Fused forward in transposed layout.

    xT_ref: (input_size, tm)   -- batch tile on lanes
    wK_ref: (out_f, in_f)      -- PyTorch nn.Linear layout
    bK_ref: (out_f, 1)         -- broadcasts along the batch/lane axis
    oT_ref: (out_dim, tm)
    """
    mm_dtype = xT_ref.dtype  # bf16 by default: MXU-native, halves x traffic

    h1 = jnp.dot(w1_ref[...], xT_ref[...],
                 preferred_element_type=jnp.float32) + b1_ref[...]
    # tanh in f32 (EUP); only cast back to the matmul dtype where bf16 helps.
    h1 = jnp.tanh(h1)

    h2 = jnp.dot(w2_ref[...], h1.astype(mm_dtype),
                 preferred_element_type=jnp.float32) + b2_ref[...]
    h2 = jnp.tanh(h2)

    out = jnp.dot(w3_ref[...], h2.astype(mm_dtype),
                  preferred_element_type=jnp.float32) + b3_ref[...]
    oT_ref[...] = out.astype(oT_ref.dtype)


def behavioral_cloning_forward(x, params, *, tile_m=2048,
                               compute_dtype=jnp.bfloat16):
    """Behavioral_Cloning forward pass as one batch-tiled Pallas kernel.

    x:      (batch, input_size), any float dtype.
    params: dict with w1 (64, input_size), b1 (64, 1), w2 (32, 64), b2 (32, 1),
            w3 (out, 32), b3 (out, 1)  -- PyTorch nn.Linear layout.
    Returns (batch, out_dim) float32.
    """
    batch, input_size = x.shape
    w1, b1 = params["w1"], params["b1"]
    w2, b2 = params["w2"], params["b2"]
    w3, b3 = params["w3"], params["b3"]
    d1, d2, out_dim = w1.shape[0], w2.shape[0], w3.shape[0]

    # Transposed activation layout; matmul operands in compute dtype (bf16
    # default), biases kept f32 so they add into the f32 accumulator exactly.
    xT = jnp.transpose(x).astype(compute_dtype)          # (input_size, batch)
    w1c = w1.astype(compute_dtype)
    w2c = w2.astype(compute_dtype)
    w3c = w3.astype(compute_dtype)
    b1c = b1.astype(jnp.float32)
    b2c = b2.astype(jnp.float32)
    b3c = b3.astype(jnp.float32)

    tm = _choose_tm(batch, tile_m)
    grid = (pl.cdiv(batch, tm),)

    x_spec = pl.BlockSpec((input_size, tm), lambda i: (0, i))
    out_spec = pl.BlockSpec((out_dim, tm), lambda i: (0, i))

    def resident_spec(arr):
        # Full-array block, constant index_map -> stays in VMEM across steps.
        return pl.BlockSpec(arr.shape, lambda i: (0, 0))

    operands = (xT, w1c, b1c, w2c, b2c, w3c, b3c)
    in_specs = [x_spec] + [resident_spec(p) for p in operands[1:]]

    # Advisory cost estimate for XLA's scheduler.
    flops = 2 * batch * (input_size * d1 + d1 * d2 + d2 * out_dim)
    transcendentals = batch * (d1 + d2)
    param_bytes = sum(int(jnp.dtype(p.dtype).itemsize) * p.size
                      for p in operands[1:])
    bytes_accessed = (batch * input_size * int(jnp.dtype(xT.dtype).itemsize)
                      + batch * out_dim * 4
                      + param_bytes)

    outT = pl.pallas_call(
        _mlp_kernel,
        out_shape=jax.ShapeDtypeStruct((out_dim, batch), jnp.float32),
        grid=grid,
        in_specs=in_specs,
        out_specs=out_spec,
        compiler_params=pltpu.CompilerParams(
            dimension_semantics=("parallel",),
        ),
        cost_estimate=pl.CostEstimate(
            flops=flops,
            transcendentals=transcendentals,
            bytes_accessed=bytes_accessed,
        ),
    )(*operands)

    return jnp.transpose(outT)  # back to the module's (batch, out_dim) layout


def init_params(key, input_size, output_size, layers=(64, 32)):
    """torch.nn.Linear-style init: U(-1/sqrt(fan_in), +1/sqrt(fan_in)).

    Weights are (out_features, in_features); biases are (out_features, 1).
    """
    dims = [input_size] + list(layers) + [output_size]
    params = {}
    for i in range(len(dims) - 1):
        fan_in, fan_out = dims[i], dims[i + 1]
        key, kw, kb = jax.random.split(key, 3)
        bound = 1.0 / math.sqrt(fan_in)
        params[f"w{i+1}"] = jax.random.uniform(
            kw, (fan_out, fan_in), jnp.float32, minval=-bound, maxval=bound)
        params[f"b{i+1}"] = jax.random.uniform(
            kb, (fan_out, 1), jnp.float32, minval=-bound, maxval=bound)
    return params


def reference_forward(x, params):
    """Plain-JAX f32 reference of the same MLP (for sanity checking)."""
    x = x.astype(jnp.float32)
    h = jnp.tanh(x @ params["w1"].T + params["b1"].T)
    h = jnp.tanh(h @ params["w2"].T + params["b2"].T)
    return h @ params["w3"].T + params["b3"].T


if __name__ == "__main__":
    # Small shapes consistent with the module: states of dim 16, 4 actions.
    input_size, output_size = 16, 4

    key = jax.random.PRNGKey(0)
    key, kx1, kx2, kx3 = jax.random.split(key, 4)
    params = init_params(key, input_size, output_size, layers=(64, 32))

    # --- Test 1: small batch, f32 compute path (exact semantics, tight tol). ---
    batch = 8
    x = jax.random.normal(kx1, (batch, input_size), jnp.float32)
    out = jax.block_until_ready(
        behavioral_cloning_forward(x, params, compute_dtype=jnp.float32))
    ref = reference_forward(x, params)
    assert out.shape == (batch, output_size)
    assert jnp.allclose(out, ref, atol=1e-5, rtol=1e-5)

    # --- Test 2: ragged batch, small tile_m -> odd->even grid rebalancing,
    #             padded last block, default bf16 matmul operands. ---
    batch2 = 2500
    x2 = jax.random.normal(kx2, (batch2, input_size), jnp.float32)
    out2 = jax.block_until_ready(
        behavioral_cloning_forward(x2, params, tile_m=1024))
    ref2 = reference_forward(x2, params)
    assert out2.shape == (batch2, output_size)
    assert jnp.allclose(out2, ref2, atol=1e-1, rtol=1e-1)

    # --- Test 3: single-step lane-dense tile (batch multiple of 128), bf16. ---
    batch3 = 1024
    x3 = jax.random.normal(kx3, (batch3, input_size), jnp.float32)
    out3 = jax.block_until_ready(behavioral_cloning_forward(x3, params))
    ref3 = reference_forward(x3, params)
    assert out3.shape == (batch3, output_size)
    assert jnp.allclose(out3, ref3, atol=1e-1, rtol=1e-1)

    print("KERNEL_OK")
</pallas_src>

<mosaic_0001>
module attributes {stable_mosaic.version = 11 : i64} {
  func.func @_mlp_kernel(%arg0: i32, %arg1: memref<16x8xf32, #tpu.memory_space<vmem>>, %arg2: memref<64x16xf32, #tpu.memory_space<vmem>>, %arg3: memref<64x1xf32, #tpu.memory_space<vmem>>, %arg4: memref<32x64xf32, #tpu.memory_space<vmem>>, %arg5: memref<32x1xf32, #tpu.memory_space<vmem>>, %arg6: memref<4x32xf32, #tpu.memory_space<vmem>>, %arg7: memref<4x1xf32, #tpu.memory_space<vmem>>, %arg8: memref<4x8xf32, #tpu.memory_space<vmem>>) attributes {dimension_semantics = [#tpu.dimension_semantics<parallel>], iteration_bounds = array<i64: 1>, scalar_prefetch = 0 : i64, scratch_operands = 0 : i64, tpu.core_type = #tpu.core_type<tc>, window_params = [{transform_indices = @transform_0, window_bounds = array<i64: 16, 8>}, {pipeline_mode = #tpu.pipeline_mode<synchronous>, transform_indices = @transform_1, window_bounds = array<i64: 64, 16>}, {pipeline_mode = #tpu.pipeline_mode<synchronous>, transform_indices = @transform_2, window_bounds = array<i64: 64, 1>}, {pipeline_mode = #tpu.pipeline_mode<synchronous>, transform_indices = @transform_3, window_bounds = array<i64: 32, 64>}, {pipeline_mode = #tpu.pipeline_mode<synchronous>, transform_indices = @transform_4, window_bounds = array<i64: 32, 1>}, {pipeline_mode = #tpu.pipeline_mode<synchronous>, transform_indices = @transform_5, window_bounds = array<i64: 4, 32>}, {pipeline_mode = #tpu.pipeline_mode<synchronous>, transform_indices = @transform_6, window_bounds = array<i64: 4, 1>}, {transform_indices = @transform_7, window_bounds = array<i64: 4, 8>}]} {
    %c0 = arith.constant 0 : index
    %c0_0 = arith.constant 0 : index
    %0 = vector.load %arg2[%c0, %c0_0] : memref<64x16xf32, #tpu.memory_space<vmem>>, vector<64x16xf32>
    %c0_1 = arith.constant 0 : index
    %c0_2 = arith.constant 0 : index
    %1 = vector.load %arg1[%c0_1, %c0_2] : memref<16x8xf32, #tpu.memory_space<vmem>>, vector<16x8xf32>
    %cst = arith.constant dense<0.000000e+00> : vector<64x8xf32>
    %2 = tpu.matmul %0, %1, %cst {dimension_numbers = #tpu.dot_dimension_numbers<[1], [0], [0], [1], [0, 0, 1, 1], [], []>} : vector<64x16xf32>, vector<16x8xf32>, vector<64x8xf32> -> vector<64x8xf32>
    %c0_3 = arith.constant 0 : index
    %c0_4 = arith.constant 0 : index
    %3 = vector.load %arg3[%c0_3, %c0_4] : memref<64x1xf32, #tpu.memory_space<vmem>>, vector<64x1xf32>
    %4 = vector.broadcast %3 : vector<64x1xf32> to vector<64x8xf32>
    %5 = arith.addf %2, %4 : vector<64x8xf32>
    %6 = math.tanh %5 : vector<64x8xf32>
    %c0_5 = arith.constant 0 : index
    %c0_6 = arith.constant 0 : index
    %7 = vector.load %arg4[%c0_5, %c0_6] : memref<32x64xf32, #tpu.memory_space<vmem>>, vector<32x64xf32>
    %cst_7 = arith.constant dense<0.000000e+00> : vector<32x8xf32>
    %8 = tpu.matmul %7, %6, %cst_7 {dimension_numbers = #tpu.dot_dimension_numbers<[1], [0], [0], [1], [0, 0, 1, 1], [], []>} : vector<32x64xf32>, vector<64x8xf32>, vector<32x8xf32> -> vector<32x8xf32>
    %c0_8 = arith.constant 0 : index
    %c0_9 = arith.constant 0 : index
    %9 = vector.load %arg5[%c0_8, %c0_9] : memref<32x1xf32, #tpu.memory_space<vmem>>, vector<32x1xf32>
    %10 = vector.broadcast %9 : vector<32x1xf32> to vector<32x8xf32>
    %11 = arith.addf %8, %10 : vector<32x8xf32>
    %12 = math.tanh %11 : vector<32x8xf32>
    %c0_10 = arith.constant 0 : index
    %c0_11 = arith.constant 0 : index
    %13 = vector.load %arg6[%c0_10, %c0_11] : memref<4x32xf32, #tpu.memory_space<vmem>>, vector<4x32xf32>
    %cst_12 = arith.constant dense<0.000000e+00> : vector<4x8xf32>
    %14 = tpu.matmul %13, %12, %cst_12 {dimension_numbers = #tpu.dot_dimension_numbers<[1], [0], [0], [1], [0, 0, 1, 1], [], []>} : vector<4x32xf32>, vector<32x8xf32>, vector<4x8xf32> -> vector<4x8xf32>
    %c0_13 = arith.constant 0 : index
    %c0_14 = arith.constant 0 : index
    %15 = vector.load %arg7[%c0_13, %c0_14] : memref<4x1xf32, #tpu.memory_space<vmem>>, vector<4x1xf32>
    %16 = vector.broadcast %15 : vector<4x1xf32> to vector<4x8xf32>
    %17 = arith.addf %14, %16 : vector<4x8xf32>
    %c0_15 = arith.constant 0 : index
    %c0_16 = arith.constant 0 : index
    %18 = vector.load %arg8[%c0_15, %c0_16] : memref<4x8xf32, #tpu.memory_space<vmem>>, vector<4x8xf32>
    tpu.vector_store %arg8[%c0_15, %c0_16], %17 {strides = array<i32>} : memref<4x8xf32, #tpu.memory_space<vmem>>, vector<4x8xf32>,
    return
  }
  func.func @transform_0(%arg0: i32) -> (i32, i32) {
    %c0_i32 = arith.constant 0 : i32
    %c0_i32_0 = arith.constant 0 : i32
    return %c0_i32, %arg0 : i32, i32
  }
  func.func @transform_1(%arg0: i32) -> (i32, i32) {
    %c0_i32 = arith.constant 0 : i32
    %c0_i32_0 = arith.constant 0 : i32
    %c0_i32_1 = arith.constant 0 : i32
    return %c0_i32, %c0_i32_0 : i32, i32
  }
  func.func @transform_2(%arg0: i32) -> (i32, i32) {
    %c0_i32 = arith.constant 0 : i32
    %c0_i32_0 = arith.constant 0 : i32
    %c0_i32_1 = arith.constant 0 : i32
    return %c0_i32, %c0_i32_0 : i32, i32
  }
  func.func @transform_3(%arg0: i32) -> (i32, i32) {
    %c0_i32 = arith.constant 0 : i32
    %c0_i32_0 = arith.constant 0 : i32
    %c0_i32_1 = arith.constant 0 : i32
    return %c0_i32, %c0_i32_0 : i32, i32
  }
  func.func @transform_4(%arg0: i32) -> (i32, i32) {
    %c0_i32 = arith.constant 0 : i32
    %c0_i32_0 = arith.constant 0 : i32
    %c0_i32_1 = arith.constant 0 : i32
    return %c0_i32, %c0_i32_0 : i32, i32
  }
  func.func @transform_5(%arg0: i32) -> (i32, i32) {
    %c0_i32 = arith.constant 0 : i32
    %c0_i32_0 = arith.constant 0 : i32
    %c0_i32_1 = arith.constant 0 : i32
    return %c0_i32, %c0_i32_0 : i32, i32
  }
  func.func @transform_6(%arg0: i32) -> (i32, i32) {
    %c0_i32 = arith.constant 0 : i32
    %c0_i32_0 = arith.constant 0 : i32
    %c0_i32_1 = arith.constant 0 : i32
    return %c0_i32, %c0_i32_0 : i32, i32
  }
  func.func @transform_7(%arg0: i32) -> (i32, i32) {
    %c0_i32 = arith.constant 0 : i32
    %c0_i32_0 = arith.constant 0 : i32
    return %c0_i32, %arg0 : i32, i32
  }
}

</mosaic_0001>

<bundles_post_ra>
// kernel: tpu_custom_call.1
= control target key start
LH: loop header
LB: loop body
LE: loop exit
PB: predicated region body
PF: predicated region fallthrough
CT: control target
= control target key end

     0   :  { %vm85_vm0 = vcmask 130048   ;;  %v360_v3 = vmov 0   ;;  %s497_s0 = inlined_call_operand.vmem [shape: f32[16,8], index: 0, kind: input, shape index: {}]   ;;  %s498_s1 = inlined_call_operand.vmem [shape: f32[64,16], index: 1, kind: input, shape index: {}]   ;;  %s499_s2 = inlined_call_operand.vmem [shape: f32[64,1], index: 2, kind: input, shape index: {}]   ;;  %s500_s3 = inlined_call_operand.vmem [shape: f32[32,64], index: 3, kind: input, shape index: {}]   ;;  %s501_s4 = inlined_call_operand.vmem [shape: f32[32,1], index: 4, kind: input, shape index: {}]   ;;  %s502_s5 = inlined_call_operand.vmem [shape: f32[4,32], index: 5, kind: input, shape index: {}]   ;;  %s503_s6 = inlined_call_operand.vmem [shape: f32[4,1], index: 6, kind: input, shape index: {}]   ;;  %s504_s7 = inlined_call_operand.hbm [shape: f32[4,8], index: 7, kind: output, shape index: {}]  }
   0x1   :  { %v36_v0 = vld [vmem:[%s497_s0 + $0x8] sm:$0xff]  ;;  %v35_v1 = vld [vmem:[%s497_s0] sm:$0xff]  ;;  %307 = vset.pattern.permute.xlu0 %v360_v3  ;;  %v44_v4 = vld [vmem:[%s499_s2 + $0x38] sm:$0xff]  ;;  %308 = vset.pattern.permute.xlu1 %v360_v3 }
   0x2   :  { %295 = vmatpush.msra.mxu3 %v36_v0  ;;  %v31_v2 = vld [vmem:[%s498_s1 + $0x20] sm:$0xff]  ;;  %82 = vperm.xlu0 %307, %v44_v4   ;;  %v42_v6 = vld [vmem:[%s499_s2 + $0x28] sm:$0xff]  ;;  %v40_v7 = vld [vmem:[%s499_s2 + $0x18] sm:$0xff] }
   0x3   :  { %124 = vmatpush.msra.mxu0 %v36_v0  ;;  %v27_v5 = vld [vmem:[%s498_s1] sm:$0xff]  ;;  %72 = vperm.xlu1 %308, %v42_v6   ;;  %v43_v8 = vld [vmem:[%s499_s2 + $0x30] sm:$0xff] }
   0x4   :  { %296 = vmatpush.msra.mxu3 %v35_v1  ;;  %309 = vset.pattern.permute.xlu2 %v360_v3 }
   0x5   :  { %286 = vmatmul.msk.f32.vlgmr.msra.gmra.mxu3 %vm85_vm0, %v31_v2  ;;  %125 = vmatpush.msra.mxu0 %v35_v1 }
   0x6   :  { %282 = vmatmul.msk.f32.vlgmr.msra.gmra.mxu0 %vm85_vm0, %v27_v5  ;;  %62 = vperm.xlu2 %309, %v40_v7  }
   0x7   :  { %12 = vsyncpa [#allocation3], 0  ;;  %v32_v9 = vld [vmem:[%s498_s1 + $0x28] sm:$0xff]  ;;  %v41_v11 = vld [vmem:[%s499_s2 + $0x20] sm:$0xff]  ;;  %vm187_vm1 = vcmask 523264   ;;  %vm240_vm2 = vcmask 261120  }
   0x8   :  { %v28_v10 = vld [vmem:[%s498_s1 + $0x8] sm:$0xff]  ;;  %v39_v12 = vld [vmem:[%s499_s2 + $0x10] sm:$0xff]  ;;  %v37_v16 = vld [vmem:[%s499_s2] sm:$0xff]  ;;  %s361_s27 = smov [#allocation2]   ;;  %s273_s8 = sshll.u32 %s504_s7, 4  ;;  %vm264_vm3 = vcmask 60416   ;;  %s274_s8 = int_to_ptr.hbm [resolvable:$true] %s273_s8 }
   0x9   :  { %v38_v13 = vld [vmem:[%s499_s2 + $0x8] sm:$0xff]  ;;  %v33_v14 = vld [vmem:[%s498_s1 + $0x30] sm:$0xff]  ;;  %v166_v17 = vld [vmem:[%s501_s4 + $0x18] sm:$0xff]  ;;  %s271_s28 = sshll.u32 %s361_s27, 4  ;;  %s272_s28 = int_to_ptr.vmem [resolvable:$true] %s271_s28 }
   0xa   :  { %77 = vperm.xlu0 %307, %v43_v8   ;;  %v29_v15 = vld [vmem:[%s498_s1 + $0x10] sm:$0xff]  ;;  %v34_v19 = vld [vmem:[%s498_s1 + $0x38] sm:$0xff]  ;;  %v164_v21 = vld [vmem:[%s501_s4 + $0x8] sm:$0xff] }
   0xb   :  { %67 = vperm.xlu1 %308, %v41_v11   ;;  %v165_v18 = vld [vmem:[%s501_s4 + $0x10] sm:$0xff]  ;;  %v30_v20 = vld [vmem:[%s498_s1 + $0x18] sm:$0xff]  ;;  %v163_v22 = vld [vmem:[%s501_s4] sm:$0xff] }
   0xc   :  { %v234_v23 = vld [vmem:[%s503_s6] sm:$0xf]  ;;  %v162_v56 = vld [vmem:[%s500_s3 + $0x18] sm:$0xff]  ;;  %v160_v58 = vld [vmem:[%s500_s3 + $0x8] sm:$0xff] }
   0xd   :  { %287 = vmatmul.msk.f32.gmra.mxu3 %vm85_vm0, %v32_v9  ;;  %v159_v55 = vld [vmem:[%s500_s3] sm:$0xff]  ;;  %v161_v59 = vld [vmem:[%s500_s3 + $0x10] sm:$0xff] }
   0xe   :  { %283 = vmatmul.msk.f32.gmra.mxu0 %vm85_vm0, %v28_v10  ;;  %57 = vperm.xlu2 %309, %v39_v12   ;;  %v233_v11 = vld [vmem:[%s502_s5] sm:$0xf] }
  0x12   :  { %52 = vperm.xlu0 %307, %v38_v13  }
  0x13   :  { %47 = vperm.xlu1 %308, %v37_v16  }
  0x15   :  { %288 = vmatmul.msk.f32.gmra.mxu3 %vm85_vm0, %v33_v14 }
  0x16   :  { %284 = vmatmul.msk.f32.gmra.mxu0 %vm85_vm0, %v29_v15  ;;  %184 = vperm.xlu2 %309, %v166_v17  }
  0x1a   :  { %179 = vperm.xlu0 %307, %v165_v18  }
  0x1b   :  { %174 = vperm.xlu1 %308, %v164_v21  }
  0x1d   :  { %289 = vmatmul.msk.f32.gmra.mxu3 %vm85_vm0, %v34_v19 }
  0x1e   :  { %285 = vmatmul.msk.f32.gmra.mxu0 %vm85_vm0, %v30_v20  ;;  %169 = vperm.xlu2 %309, %v163_v22  }
  0x22   :  { %237 = vperm.xlu0 %307, %v234_v23  }
  0x60   :  { %v63_v32 = vpop.permute.xlu2 %62 }
  0x68   :  { %v58_v42 = vpop.permute.xlu2 %57 }
  0x70   :  { %v185_v61 = vpop.permute.xlu2 %184 }
  0x74   :  { %v83_v28 = vpop.permute.xlu0 %82 }
  0x75   :  { %v73_v29 = vpop.permute.xlu1 %72 }
  0x78   :  { %v170_v7 = vpop.permute.xlu2 %169 }
  0x7c   :  { %v78_v33 = vpop.permute.xlu0 %77 }
  0x7d   :  { %v68_v34 = vpop.permute.xlu1 %67 }
  0x83   :  { %v127_v24 = vpop.f32.mrf.mxu0 }
  0x84   :  { %v53_v45 = vpop.permute.xlu0 %52 }
  0x85   :  { %v48_v46 = vpop.permute.xlu1 %47 }
  0x86   :  { %v128_v50 = vadd.f32 %v127_v24, %v48_v46 }
  0x88   :  { %v139_v25 = vpop.f32.mrf.mxu3 }
  0x89   :  { %v140_v40 = vadd.f32 %v139_v25, %v68_v34 }
  0x8b   :  { %v130_v27 = vpop.f32.mrf.mxu0 }
  0x8c   :  { %v131_v48 = vadd.f32 %v130_v27, %v53_v45  ;;  %v180_v2 = vpop.permute.xlu0 %179 }
  0x8d   :  { %v175_v3 = vpop.permute.xlu1 %174 }
  0x90   :  { %v142_v26 = vpop.f32.mrf.mxu3 }
  0x91   :  { %v143_v38 = vadd.f32 %v142_v26, %v73_v29 }
  0x93   :  { %v133_v31 = vpop.f32.mrf.mxu0 }
  0x94   :  { %v134_v44 = vadd.f32 %v133_v31, %v58_v42  ;;  %v238_v13 = vpop.permute.xlu0 %237 }
  0x98   :  { %v145_v30 = vpop.f32.mrf.mxu3 }
  0x99   :  { %v146_v36 = vadd.f32 %v145_v30, %v78_v33 }
  0x9b   :  { %v136_v39 = vpop.f32.mrf.mxu0 }
  0x9c   :  { %v137_v41 = vadd.f32 %v136_v39, %v63_v32 }
  0xa0   :  { %v148_v35 = vpop.f32.mrf.mxu3 }
  0xa1   :  { %v149_v37 = vadd.f32 %v148_v35, %v83_v28 }
  0xa3   :  { %310 = vtanh.f32 %v149_v37 }
  0xa4   :  { %312 = vtanh.f32 %v146_v36 }
  0xa5   :  { %314 = vtanh.f32 %v143_v38 }
  0xa6   :  { %316 = vtanh.f32 %v140_v40 }
  0xa7   :  { %318 = vtanh.f32 %v137_v41 }
  0xa8   :  { %320 = vtanh.f32 %v134_v44 }
  0xa9   :  { %v311_v43 = vpop.eup %310  ;;  %322 = vtanh.f32 %v131_v48 }
  0xaa   :  { %208 = vmatpush.msra.mxu1 %v311_v43  ;;  %297 = vmatpush.msra.mxu2 %v311_v43  ;;  %v313_v47 = vpop.eup %312  ;;  %324 = vtanh.f32 %v128_v50 }
  0xab   :  { %v315_v49 = vpop.eup %314 }
  0xac   :  { %209 = vmatpush.msra.mxu1 %v313_v47  ;;  %298 = vmatpush.msra.mxu2 %v313_v47  ;;  %v317_v51 = vpop.eup %316 }
  0xad   :  { %v319_v52 = vpop.eup %318 }
  0xae   :  { %210 = vmatpush.msra.mxu1 %v315_v49  ;;  %299 = vmatpush.msra.mxu2 %v315_v49  ;;  %v321_v53 = vpop.eup %320 }
  0xaf   :  { %v323_v54 = vpop.eup %322 }
  0xb0   :  { %211 = vmatpush.msra.mxu1 %v317_v51  ;;  %300 = vmatpush.msra.mxu2 %v317_v51  ;;  %v325_v57 = vpop.eup %324 }
  0xb2   :  { %212 = vmatpush.msra.mxu1 %v319_v52  ;;  %301 = vmatpush.msra.mxu2 %v319_v52 }
  0xb4   :  { %213 = vmatpush.msra.mxu1 %v321_v53  ;;  %302 = vmatpush.msra.mxu2 %v321_v53 }
  0xb6   :  { %214 = vmatpush.msra.mxu1 %v323_v54  ;;  %303 = vmatpush.msra.mxu2 %v323_v54 }
  0xb8   :  { %215 = vmatpush.msra.mxu1 %v325_v57  ;;  %304 = vmatpush.msra.mxu2 %v325_v57 }
  0xb9   :  { %290 = vmatmul.msk.f32.vlgmr.msra.gmra.mxu1 %vm187_vm1, %v159_v55  ;;  %293 = vmatmul.msk.f32.vlgmr.msra.gmra.mxu2 %vm187_vm1, %v162_v56 }
  0xc1   :  { %291 = vmatmul.msk.f32.gmra.mxu1 %vm187_vm1, %v160_v58 }
  0xc9   :  { %292 = vmatmul.msk.f32.gmra.mxu1 %vm187_vm1, %v161_v59 }
 0x136   :  { %v217_v60 = vpop.f32.mrf.mxu1 }
 0x137   :  { %v218_v8 = vadd.f32 %v217_v60, %v170_v7 }
 0x13c   :  { %v226_v62 = vpop.f32.mrf.mxu2 }
 0x13d   :  { %v227_v63 = vadd.f32 %v226_v62, %v185_v61 }
 0x13e   :  { %v220_v0 = vpop.f32.mrf.mxu1 }
 0x13f   :  { %326 = vtanh.f32 %v227_v63  ;;  %v221_v5 = vadd.f32 %v220_v0, %v175_v3 }
 0x145   :  { %v327_v1 = vpop.eup %326 }
 0x146   :  { %v223_v4 = vpop.f32.mrf.mxu1  ;;  %256 = vmatpush.msrb.mxu2 %v327_v1 }
 0x147   :  { %v224_v6 = vadd.f32 %v223_v4, %v180_v2 }
 0x149   :  { %328 = vtanh.f32 %v224_v6 }
 0x14a   :  { %330 = vtanh.f32 %v221_v5 }
 0x14b   :  { %332 = vtanh.f32 %v218_v8 }
 0x14f   :  { %v329_v9 = vpop.eup %328 }
 0x150   :  { %257 = vmatpush.msrb.mxu2 %v329_v9  ;;  %v331_v10 = vpop.eup %330 }
 0x151   :  { %v333_v12 = vpop.eup %332 }
 0x152   :  { %258 = vmatpush.msrb.mxu2 %v331_v10 }
 0x154   :  { %259 = vmatpush.msrb.mxu2 %v333_v12 }
 0x155   :  { %294 = vmatmul.msk.f32.vlgmr.msrb.gmra.mxu2 %vm240_vm2, %v233_v11 }
 0x1d8   :  { %v261_v14 = vpop.f32.mrf.mxu2 }
 0x1d9   :  { %v262_v15 = vadd.f32 %v261_v14, %v238_v13 }
 0x1db   :  { %265 = vst.msk [vmem:[#allocation2] sm:$0xf] %vm264_vm3, %v262_v15 }
 0x1dc   :  { %276 = dma.vmem_to_hbm [thread:$0]  %s272_s28, 64, %s274_s8, [#allocation3]  }
 0x1dd   :  { %358 = dma.done.wait [#allocation3], 64  }
 0x1de   :  { %359 = vsyncadd [#allocation3], 4294967232 }
 0x1df   :  { %281 = vsyncpa [#allocation3], 1 }

</bundles_post_ra>
